<compile_context>
chip_gen: v7x
topology: tpu7x:2x2x1
jax: 0.10.0
libtpu: 0.0.40
codegen_flags: <defaults>
</compile_context>

<pallas_src>
import functools

import jax
import jax.numpy as jnp
from jax.experimental import pallas as pl
from jax.experimental.pallas import tpu as pltpu


# ----------------------------- Pallas kernels ------------------------------


def _stats_kernel(x_ref, stat_ref, s_acc, sq_acc):
    """Per-channel sum / sum-of-squares for one image, reduced over HW tiles.

    x_ref:    (1, C, T) input tile (channels on sublanes, spatial on lanes)
    stat_ref: (1, C, 2) per-image partial stats (col 0 = sum, col 1 = sumsq)
    s_acc, sq_acc: (C, 1) f32 VMEM accumulators, resident across the HW axis.
    """
    j = pl.program_id(1)

    @pl.when(j == 0)
    def _():
        s_acc[...] = jnp.zeros_like(s_acc)
        sq_acc[...] = jnp.zeros_like(sq_acc)

    xb = x_ref[0].astype(jnp.float32)                        # (C, T)
    s_acc[...] += jnp.sum(xb, axis=1, keepdims=True)         # XLU reduce (C, 1)
    sq_acc[...] += jnp.sum(xb * xb, axis=1, keepdims=True)   # (C, 1)

    @pl.when(j == pl.num_programs(1) - 1)
    def _():
        # Single concatenate + tiny store per image (not per tile).
        stat_ref[0] = jnp.concatenate([s_acc[...], sq_acc[...]], axis=1)


def _apply_kernel(x_ref, scale_ref, shift_ref, o_ref, *, slope):
    """y = leaky_relu(x * scale + shift); per-channel scale/shift precomputed."""
    y = x_ref[0].astype(jnp.float32) * scale_ref[...] + shift_ref[...]  # (C, T)
    if 0.0 <= slope <= 1.0:
        # Equivalent to leaky_relu for slope in [0, 1]; avoids cmp + select.
        y = jnp.maximum(y, y * slope)
    else:
        y = jnp.where(y >= 0, y, slope * y)
    o_ref[0] = y.astype(o_ref.dtype)


# ------------------------------ tile selection ------------------------------


def _pick_hw_tile(hw, c, budget_bytes=16 * 1024 * 1024):
    """Largest lane tile whose double-buffered (in+out, f32) footprint fits the
    budget.  Tile must divide HW and be a multiple of 128 unless it covers the
    full row (the (8,128) BlockSpec rule)."""
    max_lanes = max(128, (budget_bytes // (16 * max(c, 1))) // 128 * 128)
    if hw <= max_lanes:
        return hw
    t = max_lanes
    while t >= 128:
        if hw % t == 0:
            return t
        t -= 128
    return hw  # no 128-aligned divisor: fall back to one full-row tile


# ------------------------------ Python wrapper ------------------------------


def inplace_abn_sync(x_nchw, weight, bias, *, eps=1e-5, activation_param=0.01,
                     hw_tile=None):
    """Forward pass of InPlaceABNSync in training mode (batch statistics)."""
    n, c, h, w = x_nchw.shape
    hw = h * w
    x3 = x_nchw.reshape(n, c, hw)            # free view, no transpose

    if hw_tile is None:
        hw_tile = _pick_hw_tile(hw, c)
    assert hw % hw_tile == 0, "hw_tile must divide H*W"
    grid = (n, hw // hw_tile)

    vmem_limit = 32 * 1024 * 1024

    # ---- Pass 1: per-image per-channel sum / sumsq (N axis parallel). ----
    partial = pl.pallas_call(
        _stats_kernel,
        out_shape=jax.ShapeDtypeStruct((n, c, 2), jnp.float32),
        grid=grid,
        in_specs=[pl.BlockSpec((1, c, hw_tile), lambda i, j: (i, 0, j))],
        out_specs=pl.BlockSpec((1, c, 2), lambda i, j: (i, 0, 0)),
        scratch_shapes=[pltpu.VMEM((c, 1), jnp.float32),
                        pltpu.VMEM((c, 1), jnp.float32)],
        compiler_params=pltpu.CompilerParams(
            dimension_semantics=("parallel", "arbitrary"),
            vmem_limit_bytes=vmem_limit),
    )(x3)

    # ---- Tiny per-channel math, hoisted out of the hot loop. ----
    totals = jnp.sum(partial, axis=0)                        # (C, 2)
    inv_count = jnp.float32(1.0 / (n * hw))
    mean = totals[:, 0] * inv_count                          # (C,)
    var = jnp.maximum(totals[:, 1] * inv_count - mean * mean, 0.0)
    inv_std = jax.lax.rsqrt(var + jnp.float32(eps))
    scale = weight.astype(jnp.float32) * inv_std             # (C,)
    shift = bias.astype(jnp.float32) - mean * scale          # (C,)
    scale2 = scale.reshape(c, 1)
    shift2 = shift.reshape(c, 1)

    # ---- Pass 2: normalize + affine + leaky_relu, native NCHW output. ----
    kern = functools.partial(_apply_kernel, slope=float(activation_param))
    y3 = pl.pallas_call(
        kern,
        out_shape=jax.ShapeDtypeStruct((n, c, hw), x3.dtype),
        grid=grid,
        in_specs=[
            pl.BlockSpec((1, c, hw_tile), lambda i, j: (i, 0, j)),
            pl.BlockSpec((c, 1), lambda i, j: (0, 0)),   # resident, 1-time DMA
            pl.BlockSpec((c, 1), lambda i, j: (0, 0)),
        ],
        out_specs=pl.BlockSpec((1, c, hw_tile), lambda i, j: (i, 0, j)),
        compiler_params=pltpu.CompilerParams(
            dimension_semantics=("parallel", "parallel"),
            vmem_limit_bytes=vmem_limit),
    )(x3, scale2, shift2)

    return y3.reshape(n, c, h, w)


# ---------------------------------- main ------------------------------------


if __name__ == "__main__":
    key = jax.random.PRNGKey(0)
    kx, kw, kb = jax.random.split(key, 3)
    N, C, H, W = 2, 4, 16, 16
    x = jax.random.normal(kx, (N, C, H, W), dtype=jnp.float32)

    # ABN.reset_parameters() gives weight=1, bias=0; use non-trivial values to
    # also exercise the affine path.
    weight = 1.0 + 0.1 * jax.random.normal(kw, (C,), jnp.float32)
    bias = 0.1 * jax.random.normal(kb, (C,), jnp.float32)

    # jit the whole wrapper so the tiny (C,)-sized channel math and the free
    # reshapes fuse instead of dispatching eagerly between the two kernels.
    fwd = jax.jit(functools.partial(inplace_abn_sync,
                                    eps=1e-5, activation_param=0.01))
    out = jax.block_until_ready(fwd(x, weight, bias))

    # Plain-JAX reference of the same math (training-mode batch norm with
    # biased variance, then leaky_relu).
    mean = jnp.mean(x, axis=(0, 2, 3), keepdims=True)
    var = jnp.mean(x * x, axis=(0, 2, 3), keepdims=True) - mean * mean
    ref = (x - mean) * jax.lax.rsqrt(var + 1e-5)
    ref = ref * weight.reshape(1, C, 1, 1) + bias.reshape(1, C, 1, 1)
    ref = jnp.where(ref >= 0, ref, 0.01 * ref)

    assert out.shape == (N, C, H, W)
    assert jnp.max(jnp.abs(out - ref)) < 1e-4

    print("KERNEL_OK")
</pallas_src>

<mosaic_0001>
module attributes {stable_mosaic.version = 11 : i64} {
  func.func @_stats_kernel(%arg0: i32, %arg1: i32, %arg2: memref<1x4x256xf32, #tpu.memory_space<vmem>>, %arg3: memref<1x4x2xf32, #tpu.memory_space<vmem>>, %arg4: memref<4x1xf32, #tpu.memory_space<vmem>>, %arg5: memref<4x1xf32, #tpu.memory_space<vmem>>) attributes {dimension_semantics = [#tpu.dimension_semantics<parallel>, #tpu.dimension_semantics<arbitrary>], iteration_bounds = array<i64: 2, 1>, scalar_prefetch = 0 : i64, scratch_operands = 2 : i64, tpu.core_type = #tpu.core_type<tc>, window_params = [{transform_indices = @transform_0, window_bounds = array<i64: 1, 4, 256>}, {transform_indices = @transform_1, window_bounds = array<i64: 1, 4, 2>}]} {
    %c0_i32 = arith.constant 0 : i32
    %0 = arith.cmpi eq, %arg1, %c0_i32 : i32
    %1 = arith.extui %0 : i1 to i32
    %c0_i32_0 = arith.constant 0 : i32
    %2 = arith.cmpi ne, %1, %c0_i32_0 : i32
    scf.if %2 {
      %cst_14 = arith.constant 0.000000e+00 : f32
      %19 = vector.broadcast %cst_14 : f32 to vector<4x1xf32>
      %c0_15 = arith.constant 0 : index
      %c0_16 = arith.constant 0 : index
      %20 = vector.load %arg4[%c0_15, %c0_16] : memref<4x1xf32, #tpu.memory_space<vmem>>, vector<4x1xf32>
      tpu.vector_store %arg4[%c0_15, %c0_16], %19 {strides = array<i32>} : memref<4x1xf32, #tpu.memory_space<vmem>>, vector<4x1xf32>,
      %cst_17 = arith.constant 0.000000e+00 : f32
      %21 = vector.broadcast %cst_17 : f32 to vector<4x1xf32>
      %c0_18 = arith.constant 0 : index
      %c0_19 = arith.constant 0 : index
      %22 = vector.load %arg5[%c0_18, %c0_19] : memref<4x1xf32, #tpu.memory_space<vmem>>, vector<4x1xf32>
      tpu.vector_store %arg5[%c0_18, %c0_19], %21 {strides = array<i32>} : memref<4x1xf32, #tpu.memory_space<vmem>>, vector<4x1xf32>,
    } else {
    }
    %c0 = arith.constant 0 : index
    %c0_1 = arith.constant 0 : index
    %c0_2 = arith.constant 0 : index
    %3 = vector.load %arg2[%c0, %c0_1, %c0_2] : memref<1x4x256xf32, #tpu.memory_space<vmem>>, vector<1x4x256xf32>
    %4 = vector.shape_cast %3 : vector<1x4x256xf32> to vector<4x256xf32>
    %c0_3 = arith.constant 0 : index
    %c0_4 = arith.constant 0 : index
    %5 = vector.load %arg4[%c0_3, %c0_4] : memref<4x1xf32, #tpu.memory_space<vmem>>, vector<4x1xf32>
    %cst = arith.constant dense<0.000000e+00> : vector<4xf32>
    %6 = vector.multi_reduction <add>, %4, %cst [1] : vector<4x256xf32> to vector<4xf32>
    %7 = vector.shape_cast %6 : vector<4xf32> to vector<4x1xf32>
    %8 = arith.addf %5, %7 : vector<4x1xf32>
    %c0_5 = arith.constant 0 : index
    %c0_6 = arith.constant 0 : index
    %9 = vector.load %arg4[%c0_5, %c0_6] : memref<4x1xf32, #tpu.memory_space<vmem>>, vector<4x1xf32>
    tpu.vector_store %arg4[%c0_5, %c0_6], %8 {strides = array<i32>} : memref<4x1xf32, #tpu.memory_space<vmem>>, vector<4x1xf32>,
    %c0_7 = arith.constant 0 : index
    %c0_8 = arith.constant 0 : index
    %10 = vector.load %arg5[%c0_7, %c0_8] : memref<4x1xf32, #tpu.memory_space<vmem>>, vector<4x1xf32>
    %11 = arith.mulf %4, %4 : vector<4x256xf32>
    %cst_9 = arith.constant dense<0.000000e+00> : vector<4xf32>
    %12 = vector.multi_reduction <add>, %11, %cst_9 [1] : vector<4x256xf32> to vector<4xf32>
    %13 = vector.shape_cast %12 : vector<4xf32> to vector<4x1xf32>
    %14 = arith.addf %10, %13 : vector<4x1xf32>
    %c0_10 = arith.constant 0 : index
    %c0_11 = arith.constant 0 : index
    %15 = vector.load %arg5[%c0_10, %c0_11] : memref<4x1xf32, #tpu.memory_space<vmem>>, vector<4x1xf32>
    tpu.vector_store %arg5[%c0_10, %c0_11], %14 {strides = array<i32>} : memref<4x1xf32, #tpu.memory_space<vmem>>, vector<4x1xf32>,
    %c0_i32_12 = arith.constant 0 : i32
    %16 = arith.cmpi eq, %arg1, %c0_i32_12 : i32
    %17 = arith.extui %16 : i1 to i32
    %c0_i32_13 = arith.constant 0 : i32
    %18 = arith.cmpi ne, %17, %c0_i32_13 : i32
    scf.if %18 {
      %c0_14 = arith.constant 0 : index
      %c0_15 = arith.constant 0 : index
      %19 = vector.load %arg4[%c0_14, %c0_15] : memref<4x1xf32, #tpu.memory_space<vmem>>, vector<4x1xf32>
      %c0_16 = arith.constant 0 : index
      %c0_17 = arith.constant 0 : index
      %20 = vector.load %arg5[%c0_16, %c0_17] : memref<4x1xf32, #tpu.memory_space<vmem>>, vector<4x1xf32>
      %21 = tpu.concatenate %19, %20 in 1 : vector<4x1xf32>, vector<4x1xf32> -> vector<4x2xf32>
      %c0_18 = arith.constant 0 : index
      %c0_19 = arith.constant 0 : index
      %c0_20 = arith.constant 0 : index
      %22 = vector.load %arg3[%c0_18, %c0_19, %c0_20] : memref<1x4x2xf32, #tpu.memory_space<vmem>>, vector<1x4x2xf32>
      %23 = vector.shape_cast %22 : vector<1x4x2xf32> to vector<4x2xf32>
      %24 = vector.shape_cast %21 : vector<4x2xf32> to vector<1x4x2xf32>
      tpu.vector_store %arg3[%c0_18, %c0_19, %c0_20], %24 {strides = array<i32>} : memref<1x4x2xf32, #tpu.memory_space<vmem>>, vector<1x4x2xf32>,
    } else {
    }
    return
  }
  func.func @transform_0(%arg0: i32, %arg1: i32) -> (i32, i32, i32) {
    %c0_i32 = arith.constant 0 : i32
    %c0_i32_0 = arith.constant 0 : i32
    return %arg0, %c0_i32, %arg1 : i32, i32, i32
  }
  func.func @transform_1(%arg0: i32, %arg1: i32) -> (i32, i32, i32) {
    %c0_i32 = arith.constant 0 : i32
    %c0_i32_0 = arith.constant 0 : i32
    %c0_i32_1 = arith.constant 0 : i32
    return %arg0, %c0_i32, %c0_i32_0 : i32, i32, i32
  }
}

module attributes {stable_mosaic.version = 11 : i64} {
  func.func @_apply_kernel(%arg0: i32, %arg1: i32, %arg2: memref<1x4x256xf32, #tpu.memory_space<vmem>>, %arg3: memref<4x1xf32, #tpu.memory_space<vmem>>, %arg4: memref<4x1xf32, #tpu.memory_space<vmem>>, %arg5: memref<1x4x256xf32, #tpu.memory_space<vmem>>) attributes {dimension_semantics = [#tpu.dimension_semantics<parallel>, #tpu.dimension_semantics<parallel>], iteration_bounds = array<i64: 2, 1>, scalar_prefetch = 0 : i64, scratch_operands = 0 : i64, tpu.core_type = #tpu.core_type<tc>, window_params = [{transform_indices = @transform_0, window_bounds = array<i64: 1, 4, 256>}, {pipeline_mode = #tpu.pipeline_mode<synchronous>, transform_indices = @transform_1, window_bounds = array<i64: 4, 1>}, {pipeline_mode = #tpu.pipeline_mode<synchronous>, transform_indices = @transform_2, window_bounds = array<i64: 4, 1>}, {transform_indices = @transform_3, window_bounds = array<i64: 1, 4, 256>}]} {
    %c0 = arith.constant 0 : index
    %c0_0 = arith.constant 0 : index
    %c0_1 = arith.constant 0 : index
    %0 = vector.load %arg2[%c0, %c0_0, %c0_1] : memref<1x4x256xf32, #tpu.memory_space<vmem>>, vector<1x4x256xf32>
    %1 = vector.shape_cast %0 : vector<1x4x256xf32> to vector<4x256xf32>
    %c0_2 = arith.constant 0 : index
    %c0_3 = arith.constant 0 : index
    %2 = vector.load %arg3[%c0_2, %c0_3] : memref<4x1xf32, #tpu.memory_space<vmem>>, vector<4x1xf32>
    %3 = vector.broadcast %2 : vector<4x1xf32> to vector<4x256xf32>
    %4 = arith.mulf %1, %3 : vector<4x256xf32>
    %c0_4 = arith.constant 0 : index
    %c0_5 = arith.constant 0 : index
    %5 = vector.load %arg4[%c0_4, %c0_5] : memref<4x1xf32, #tpu.memory_space<vmem>>, vector<4x1xf32>
    %6 = vector.broadcast %5 : vector<4x1xf32> to vector<4x256xf32>
    %7 = arith.addf %4, %6 : vector<4x256xf32>
    %cst = arith.constant 0.00999999977 : f32
    %8 = vector.broadcast %cst : f32 to vector<4x256xf32>
    %9 = arith.mulf %7, %8 : vector<4x256xf32>
    %10 = arith.maximumf %7, %9 : vector<4x256xf32>
    %c0_6 = arith.constant 0 : index
    %c0_7 = arith.constant 0 : index
    %c0_8 = arith.constant 0 : index
    %11 = vector.load %arg5[%c0_6, %c0_7, %c0_8] : memref<1x4x256xf32, #tpu.memory_space<vmem>>, vector<1x4x256xf32>
    %12 = vector.shape_cast %11 : vector<1x4x256xf32> to vector<4x256xf32>
    %13 = vector.shape_cast %10 : vector<4x256xf32> to vector<1x4x256xf32>
    tpu.vector_store %arg5[%c0_6, %c0_7, %c0_8], %13 {strides = array<i32>} : memref<1x4x256xf32, #tpu.memory_space<vmem>>, vector<1x4x256xf32>,
    return
  }
  func.func @transform_0(%arg0: i32, %arg1: i32) -> (i32, i32, i32) {
    %c0_i32 = arith.constant 0 : i32
    %c0_i32_0 = arith.constant 0 : i32
    return %arg0, %c0_i32, %arg1 : i32, i32, i32
  }
  func.func @transform_1(%arg0: i32, %arg1: i32) -> (i32, i32) {
    %c0_i32 = arith.constant 0 : i32
    %c0_i32_0 = arith.constant 0 : i32
    %c0_i32_1 = arith.constant 0 : i32
    return %c0_i32, %c0_i32_0 : i32, i32
  }
  func.func @transform_2(%arg0: i32, %arg1: i32) -> (i32, i32) {
    %c0_i32 = arith.constant 0 : i32
    %c0_i32_0 = arith.constant 0 : i32
    %c0_i32_1 = arith.constant 0 : i32
    return %c0_i32, %c0_i32_0 : i32, i32
  }
  func.func @transform_3(%arg0: i32, %arg1: i32) -> (i32, i32, i32) {
    %c0_i32 = arith.constant 0 : i32
    %c0_i32_0 = arith.constant 0 : i32
    return %arg0, %c0_i32, %arg1 : i32, i32, i32
  }
}

</mosaic_0001>

<bundles_post_ra>
// kernel: inplace_abn_sync.3
= control target key start
LH: loop header
LB: loop body
LE: loop exit
PB: predicated region body
PF: predicated region fallthrough
CT: control target
= control target key end

     0   :  { %s415_s12 = smov 0   ;;  %s417_s13 = smov 0   ;;  %s454_s0 = inlined_call_operand.vmem [shape: f32[2,4,256], index: 0, kind: input, shape index: {}]   ;;  %s455_s1 = inlined_call_operand.vmem [shape: f32[4,1], index: 1, kind: input, shape index: {}]   ;;  %s456_s2 = inlined_call_operand.vmem [shape: f32[4,1], index: 2, kind: input, shape index: {}]   ;;  %s457_s3 = inlined_call_operand.vmem [shape: f32[2,4,256], index: 3, kind: output, shape index: {}]  }
   0x1   :  { %s419_s14 = smov 0  }
   0x2 LB: > { %s25_s15 = sadd.s32 1, %s387_s13  ;;  %p333_p0 = scmp.ge.s32.totalorder %s391_s14, 1  ;;  %s391_s14 = sphi %s419_s14, %s13_s14   ;;  %s387_s13 = sphi %s417_s13, %s459_s13   ;;  %s383_s12 = sphi %s415_s12, %s458_s12  }
   0x3   : > { %p27_p1 = scmp.ge.s32.totalorder %s25_s15, 2  ;;  %p158_p2 = scmp.lt.s32.totalorder %s391_s14, 3 }
   0x5   : > { %s461_s15 = smov (%p27_p1, %s25_s15), 0  ;;  %p159_p3 = pnand %p333_p0, %p158_p2 }
   0x6   : > { %v211_v0 = vld [vmem:[%s455_s1] sm:$0xf] (!%p159_p3)  ;;  %v393_v1 = vmov (!%p159_p3), 0   ;;  %p191_p4 = scmp.lt.s32.totalorder (!%p159_p3), %s383_s12, 1  ;;  %v394_v3 = vmov (!%p159_p3), 839922192   ;;  %v219_v5 = vlaneseq (!%p159_p3) }
   0x7   : > { %162 = sbr.rel (%p159_p3) target bundleno = 149 (0x95), region = 32  ;;  %368 = vset.pattern.permute.xlu0 (!%p159_p3), %v393_v1  ;;  %v225_v2 = vld [vmem:[%s456_s2] sm:$0xf] (!%p159_p3)  ;;  %v217_v4 = vunpack.c.l.s4 (!%p159_p3), %v394_v3 }
   0x8   : > { %214 = vperm.xlu0 (!%p159_p3), %368, %v211_v0   ;;  %v220_v7 = vshrl.u32 (!%p159_p3), %v219_v5, 7 }
   0x9   : > { %v218_v6 = vunpack.c.0.s8 (!%p159_p3), %v217_v4 }
   0xb   : > { %v221_v8 = vsub.s32 (!%p159_p3), %v218_v6, %v220_v7 }
   0xc   : > { %228 = vperm.xlu0 (!%p159_p3), %368, %v225_v2  }
   0xe   : > { %s463_s12 = smov (!%p191_p4, %s383_s12), 1 }
   0xf   : > { %s340_s20 = sshll.u32 %s463_s12, 3 }
  0x10   : > { %s198_s23 = scalar_lea.vmem %s454_s0, %s340_s20  ;;  %s208_s26 = scalar_lea.vmem %s457_s3, %s340_s20 }
  0x11   : > { %v210_v11 = vld [vmem:[%s198_s23] sm:$0xff] }
  0x87   : > { %v215_v9 = vpop.permute.xlu0 %214 }
  0x88   : > { %v222_v10 = vrot.slane %v215_v9, %v221_v8 }
  0x8a   : > { %v224_v13 = vmul.f32 %v222_v10, %v210_v11 }
  0x8b   : > { %v229_v12 = vpop.permute.xlu0 %228 }
  0x8c   : > { %v236_v14 = vrot.slane %v229_v12, %v221_v8 }
  0x8e   : > { %v238_v15 = vadd.f32 %v236_v14, %v224_v13 }
  0x90   : > { %v239_v16 = vmul.f32 0.01, %v238_v15 }
  0x92   : > { %v240_v17 = vmax.f32 %v238_v15, %v239_v16 }
  0x94   : > { %241 = vst [vmem:[%s208_s26] sm:$0xff] %v240_v17 }
  0x95 PF: > { %s13_s14 = sadd.s32 1, %s391_s14   ;;  %s458_s12 = smov %s387_s13 }
  0x96   : > { %p10_p5 = scmp.ge.s32.totalorder %s13_s14, 4   ;;  %s459_s13 = smov %s461_s15 }
  0x98   :  { %12 = sbr.rel (!%p10_p5) target bundleno = 2 (0x2), region = 62 }

// kernel: inplace_abn_sync.2
= control target key start
LH: loop header
LB: loop body
LE: loop exit
PB: predicated region body
PF: predicated region fallthrough
CT: control target
= control target key end

     0   :  { %s330_s6 = smov 0   ;;  %s332_s7 = smov 0   ;;  %s371_s0 = inlined_call_operand.vmem [shape: f32[2,4,256], index: 0, kind: input, shape index: {}]   ;;  %s372_s1 = inlined_call_operand.vmem [shape: f32[2,4,2], index: 1, kind: output, shape index: {}]  }
   0x1   :  { %s334_s8 = smov 0  }
   0x2 LB: > { %s23_s9 = sadd.s32 1, %s312_s7  ;;  %p260_p0 = scmp.ge.s32.totalorder %s316_s8, 1  ;;  %s316_s8 = sphi %s334_s8, %s11_s8   ;;  %s312_s7 = sphi %s332_s7, %s374_s7   ;;  %s308_s6 = sphi %s330_s6, %s373_s6  }
   0x3   : > { %p25_p1 = scmp.ge.s32.totalorder %s23_s9, 2  ;;  %p106_p2 = scmp.lt.s32.totalorder %s316_s8, 3 }
   0x5   : > { %s376_s9 = smov (%p25_p1, %s23_s9), 0  ;;  %p107_p3 = pnand %p260_p0, %p106_p2 }
   0x6   : > { %p130_p4 = scmp.lt.s32.totalorder (!%p107_p3), %s308_s6, 1  ;;  %vm147_vm0 = vcmask (!%p107_p3), 3072   ;;  %v318_v0 = vmov (!%p107_p3), 0.0   ;;  %vm155_vm1 = vcmask (!%p107_p3), 1043456   ;;  %s319_s14 = smov (!%p107_p3), 1   ;;  %vm185_vm2 = vcmask (!%p107_p3), 7168  }
   0x7   : > { %110 = sbr.rel (%p107_p3) target bundleno = 294 (0x126), region = 24  ;;  %149 = vst.msk [vmem:[#allocation3] sm:$0xf] (!%p107_p3), %vm147_vm0, %v318_v0  ;;  %148 = vst.msk [vmem:[#allocation2] sm:$0xf] (!%p107_p3), %vm147_vm0, %v318_v0  ;;  %vm187_vm3 = vcmask (!%p107_p3), 11264  }
   0xe   : > { %s378_s6 = smov (!%p130_p4, %s308_s6), 1  ;;  %v164_v11 = vld [vmem:[#allocation3] sm:$0xf]  ;;  %v151_v14 = vld [vmem:[#allocation2] sm:$0xf] }
   0xf   : > { %s266_s10 = sshll.u32 %s378_s6, 3  ;;  %s263_s15 = sshll.u32 %s378_s6, 2 }
  0x10   : > { %s137_s13 = scalar_lea.vmem %s371_s0, %s266_s10  ;;  %s142_s18 = scalar_lea.vmem %s372_s1, %s263_s15 }
  0x11   : > { %v150_v1 = vld [vmem:[%s137_s13] sm:$0xff] }
  0x12   : > { %v165_v2 = vmul.f32 %v150_v1, %v150_v1  ;;  %v153_v3 = vcombine.high %v150_v1, %v150_v1  ;;  %v156_v7 = vsel %vm155_vm1, %v150_v1, 0.0 }
  0x14   : > { %v167_v4 = vcombine.high %v165_v2, %v165_v2  ;;  %v169_v5 = vsel %vm155_vm1, %v165_v2, 0.0  ;;  %v157_v8 = vsel %vm155_vm1, %v153_v3, 0.0 }
  0x15   : > { %v158_v10 = vadd.f32 %v157_v8, %v156_v7 }
  0x16   : > { %v170_v6 = vsel %vm155_vm1, %v167_v4, 0.0 }
  0x17   : > { %v171_v9 = vadd.f32 %v170_v6, %v169_v5 }
  0x19   : > { %172 = vadd.xlane.f32.xlu0 %v171_v9 }
  0x1d   : > { %159 = vadd.xlane.f32.xlu0 %v158_v10 }
  0xa6   : > { %v173_v12 = vpop.xlane.xlu0 %172 }
  0xa7   : > { %v174_v13 = vadd.f32 %v173_v12, %v164_v11 }
  0xa9   : > { %175 = vst.msk [vmem:[#allocation3] sm:$0xf] %vm147_vm0, %v174_v13 }
  0xaa   : > { %v160_v15 = vpop.xlane.xlu0 %159 }
  0xab   : > { %v161_v16 = vadd.f32 %v160_v15, %v151_v14 }
  0xad   : > { %163 = vst.msk [vmem:[#allocation2] sm:$0xf] %vm147_vm0, %v161_v16 }
  0xb0   : > { %v180_v17 = vld [vmem:[#allocation3] sm:$0xf] }
  0xb1   : > { %182 = vrot.lane.b32.xlu1 %v180_v17, %s319_s14 }
  0xb4   : > { %v179_v18 = vld [vmem:[#allocation2] sm:$0xf] }
 0x123   : > { %v183_v19 = vpop.permute.xlu1 %182 }
 0x124   : > { %v186_v20 = vsel %vm185_vm2, %v179_v18, %v183_v19 }
 0x125   : > { %188 = vst.msk [vmem:[%s142_s18] sm:$0xf] %vm187_vm3, %v186_v20 }
 0x126 PF: > { %s11_s8 = sadd.s32 1, %s316_s8   ;;  %s373_s6 = smov %s312_s7 }
 0x127   : > { %p8_p5 = scmp.ge.s32.totalorder %s11_s8, 4   ;;  %s374_s7 = smov %s376_s9 }
 0x129   :  { %10 = sbr.rel (!%p8_p5) target bundleno = 2 (0x2), region = 62 }

</bundles_post_ra>
